<compile_context>
chip_gen: v7x
topology: tpu7x:2x2x1
jax: 0.10.0
libtpu: 0.0.40
codegen_flags: <defaults>
</compile_context>

<pallas_src>
import functools

import jax
import jax.numpy as jnp
from jax.experimental import pallas as pl
from jax.experimental.pallas import tpu as pltpu


# ------------------------------ small helpers ------------------------------

def _round_up(x, m):
    return ((x + m - 1) // m) * m


def _cdiv(a, b):
    return -(-a // b)


def fold_bn(gamma, beta, mean, var, eps=1e-5):
    """Fold BN into a per-channel affine; returned as (C,1) columns (sublane)."""
    scale = gamma / jnp.sqrt(var + eps)
    shift = beta - mean * scale
    return scale[:, None].astype(jnp.float32), shift[:, None].astype(jnp.float32)


def im2col_3x3_s2_p1_t(x_nhwc):
    """3x3 / stride-2 / pad-1 patches, contraction-major. -> (N, 9*C, Ho*Wo)."""
    N, H, W, C = x_nhwc.shape
    k, s, p = 3, 2, 1
    xp = jnp.pad(x_nhwc, ((0, 0), (p, p), (p, p), (0, 0)))
    Ho = (H + 2 * p - k) // s + 1
    Wo = (W + 2 * p - k) // s + 1
    cols = [xp[:, kh:kh + s * Ho:s, kw:kw + s * Wo:s, :]
            for kh in range(k) for kw in range(k)]
    patches = jnp.stack(cols, axis=1)                   # (N, 9, Ho, Wo, C)
    patches = jnp.transpose(patches, (0, 1, 4, 2, 3))   # (N, 9, C, Ho, Wo)
    return patches.reshape(N, k * k * C, Ho * Wo), Ho, Wo


def _pick_tiling(hw, device_kind):
    """Large lane-dense spatial tiles; cap lower on v4/v5 (single vst slot)."""
    kind = device_kind.lower()
    cap = 2048 if ("v5" in kind or "v4" in kind) else 8192
    hw128 = _round_up(hw, 128)
    n_tiles = max(1, _cdiv(hw128, cap))
    tile_hw = _round_up(_cdiv(hw128, n_tiles), 128)
    return tile_hw, n_tiles * tile_hw


# ------------------------------ fused kernel -------------------------------

def _fused_forward_kernel(p_ref, ws_ref, s0_ref, b0_ref,
                          wh_ref, s1_ref, b1_ref,
                          wo_ref, bo_ref,
                          out_ref, acc_ref,
                          *, hw_valid, tile_hw, inv_hw, compute_dtype):
    t = pl.program_id(1)

    @pl.when(t == 0)
    def _init():
        acc_ref[...] = jnp.zeros_like(acc_ref)

    # --- stem conv (3x3/s2 as matmul, channels on sublanes) + BN + SiLU ---
    x = p_ref[0]                                               # (9*Cin, T) bf16
    y = jnp.dot(ws_ref[...], x, preferred_element_type=jnp.float32)   # (Cs, T)
    y = y * s0_ref[...] + b0_ref[...]                          # f32 affine
    y = y.astype(compute_dtype)
    y = y * jax.nn.sigmoid(y)                                  # SiLU (bf16 on v6e/v7x)

    # --- 1x1 head conv + BN + SiLU (never leaves VMEM) ---
    z = jnp.dot(wh_ref[...], y.astype(wh_ref.dtype),
                preferred_element_type=jnp.float32)            # (D, T) f32
    z = z * s1_ref[...] + b1_ref[...]
    z = z * jax.nn.sigmoid(z.astype(compute_dtype)).astype(jnp.float32)

    # --- global-average-pool partial sums; mask only on the ragged tile ---
    tile_start = t * tile_hw

    @pl.when(tile_start + tile_hw <= hw_valid)
    def _full_tile():
        acc_ref[...] += jnp.sum(z, axis=-1, keepdims=True)

    @pl.when(tile_start + tile_hw > hw_valid)
    def _ragged_tile():
        col = tile_start + jax.lax.broadcasted_iota(jnp.int32, z.shape, 1)
        zm = jnp.where(col < hw_valid, z, 0.0)
        acc_ref[...] += jnp.sum(zm, axis=-1, keepdims=True)

    # --- finalize: mean, merged lane-dense (reg | cls) heads, all f32 ---
    @pl.when(t == pl.num_programs(1) - 1)
    def _finalize():
        feats = acc_ref[...] * inv_hw                          # (D, 1) f32
        out = jnp.sum(feats * wo_ref[...], axis=0, keepdims=True) + bo_ref[...]
        out_ref[0] = out                                       # (1, out_pad)


def fused_forward(patches, w_stem, s0, b0, w_head, s1, b1, w_out, b_out,
                  *, hw_valid, tile_hw, compute_dtype):
    N, Kc, hw_pad = patches.shape
    c_stem = w_stem.shape[0]
    D = w_head.shape[0]
    out_pad = w_out.shape[1]
    n_tiles = hw_pad // tile_hw

    kernel = functools.partial(
        _fused_forward_kernel, hw_valid=hw_valid, tile_hw=tile_hw,
        inv_hw=1.0 / hw_valid, compute_dtype=compute_dtype)

    cost = pl.CostEstimate(
        flops=2 * N * hw_pad * (Kc * c_stem + c_stem * D) + 2 * N * D * out_pad,
        transcendentals=N * hw_pad * (c_stem + D),
        bytes_accessed=(patches.size * 2
                        + (w_stem.size + w_head.size) * 2
                        + (w_out.size + b_out.size + s0.size + b0.size
                           + s1.size + b1.size) * 4
                        + N * out_pad * 4))

    return pl.pallas_call(
        kernel,
        out_shape=jax.ShapeDtypeStruct((N, 1, out_pad), jnp.float32),
        grid_spec=pltpu.PrefetchScalarGridSpec(
            num_scalar_prefetch=0,
            grid=(N, n_tiles),
            in_specs=[
                pl.BlockSpec((1, Kc, tile_hw), lambda n, t: (n, 0, t)),   # patches
                pl.BlockSpec((c_stem, Kc), lambda n, t: (0, 0)),          # w_stem^T
                pl.BlockSpec((c_stem, 1), lambda n, t: (0, 0)),           # bn0 scale
                pl.BlockSpec((c_stem, 1), lambda n, t: (0, 0)),           # bn0 shift
                pl.BlockSpec((D, c_stem), lambda n, t: (0, 0)),           # w_head
                pl.BlockSpec((D, 1), lambda n, t: (0, 0)),                # bn1 scale
                pl.BlockSpec((D, 1), lambda n, t: (0, 0)),                # bn1 shift
                pl.BlockSpec((D, out_pad), lambda n, t: (0, 0)),          # merged W (f32)
                pl.BlockSpec((1, out_pad), lambda n, t: (0, 0)),          # merged b (f32)
            ],
            out_specs=pl.BlockSpec((1, 1, out_pad), lambda n, t: (n, 0, 0)),
            scratch_shapes=[pltpu.VMEM((D, 1), jnp.float32)],             # pool acc
        ),
        compiler_params=pltpu.CompilerParams(
            dimension_semantics=("parallel", "arbitrary"),
            vmem_limit_bytes=32 * 1024 * 1024),
        cost_estimate=cost,
    )(patches, w_stem, s0, b0, w_head, s1, b1, w_out, b_out)


# ------------------------------- forward glue ------------------------------

def efficientnet_large_multi_forward(x_nchw, params, cfg):
    # NCHW -> NHWC, then channels-major im2col (spatial ends up on lanes).
    x = jnp.transpose(x_nchw, (0, 2, 3, 1)).astype(jnp.float32)
    N = x.shape[0]
    D = cfg["input_dim"]
    n_reg = cfg["output_dim_reg"]
    n_cls = cfg["output_dim_cls"]

    patches, Ho, Wo = im2col_3x3_s2_p1_t(x)              # (N, 36, HW)
    HW = Ho * Wo

    dev_kind = jax.devices()[0].device_kind
    tile_hw, hw_pad = _pick_tiling(HW, dev_kind)
    if hw_pad != HW:
        patches = jnp.pad(patches, ((0, 0), (0, 0), (0, hw_pad - HW)))
    patches = patches.astype(jnp.bfloat16)               # bf16 feed to MXU

    # bf16 elementwise (SiLU) only where the VPU/EUP are bf16-capable.
    kind = dev_kind.lower()
    compute_dtype = jnp.bfloat16 if ("v6" in kind or "v7" in kind) else jnp.float32

    # --- weight prep (tiny, once per call) ---
    c_stem = params["stem_w"].shape[0]
    # torch (Cout, Cin, KH, KW) -> (Cout, KH*KW*Cin), matching patch tap order.
    w_stem = jnp.transpose(params["stem_w"], (0, 2, 3, 1)).reshape(c_stem, -1)
    w_stem = w_stem.astype(jnp.bfloat16)                 # (64, 36)
    s0, b0 = fold_bn(*params["stem_bn"])                 # (64, 1) each
    w_head = params["head_w"].astype(jnp.bfloat16)       # (D, 64) — already (out, in)
    s1, b1 = fold_bn(*params["head_bn"])                 # (D, 1) each

    # Merge reg/cls heads into one lane-dense f32 (D, 128k) weight (zero-padded).
    out_pad = _round_up(n_reg + n_cls, 128)
    w_out = jnp.zeros((D, out_pad), jnp.float32)
    w_out = w_out.at[:, :n_reg].set(jnp.transpose(params["reg_w"], (1, 0)))
    w_out = w_out.at[:, n_reg:n_reg + n_cls].set(jnp.transpose(params["cls_w"], (1, 0)))
    b_out = jnp.zeros((1, out_pad), jnp.float32)
    b_out = b_out.at[0, :n_reg].set(params["reg_b"])
    b_out = b_out.at[0, n_reg:n_reg + n_cls].set(params["cls_b"])

    # --- one fused kernel: stem -> 1x1 conv -> avg-pool -> heads ---
    out = fused_forward(patches, w_stem, s0, b0, w_head, s1, b1, w_out, b_out,
                        hw_valid=HW, tile_hw=tile_hw,
                        compute_dtype=compute_dtype)     # (N, 1, out_pad)
    out = out.reshape(N, out_pad)
    reg = out[:, :n_reg]
    cls = out[:, n_reg:n_reg + n_cls]
    return reg, cls                                      # (reg_head(f), cls_head(f))


# ------------------------------- param init --------------------------------

def init_params(cfg, key):
    ks = jax.random.split(key, 8)
    c_in, c_stem, d = 4, 64, cfg["input_dim"]

    def bn(c):
        return (jnp.ones((c,), jnp.float32),             # gamma
                jnp.zeros((c,), jnp.float32),            # beta
                jnp.zeros((c,), jnp.float32),            # running_mean
                jnp.ones((c,), jnp.float32))             # running_var

    return {
        "stem_w": 0.1 * jax.random.normal(ks[0], (c_stem, c_in, 3, 3), jnp.float32),
        "stem_bn": bn(c_stem),
        "head_w": 0.1 * jax.random.normal(ks[1], (d, c_stem), jnp.float32),
        "head_bn": bn(d),
        "reg_w": 0.1 * jax.random.normal(ks[2], (cfg["output_dim_reg"], d), jnp.float32),
        "reg_b": 0.01 * jax.random.normal(ks[3], (cfg["output_dim_reg"],), jnp.float32),
        "cls_w": 0.1 * jax.random.normal(ks[4], (cfg["output_dim_cls"], d), jnp.float32),
        "cls_b": 0.01 * jax.random.normal(ks[5], (cfg["output_dim_cls"],), jnp.float32),
    }


# ---------------------------------- main ------------------------------------

if __name__ == "__main__":
    cfg = {"input_dim": 128, "output_dim_cls": 5, "output_dim_reg": 3,
           "change_first_layer": True, "freeze": False}

    key = jax.random.PRNGKey(0)
    k_x, k_p = jax.random.split(key)
    x = jax.random.normal(k_x, (2, 4, 16, 16), jnp.float32)   # NCHW like PyTorch
    params = init_params(cfg, k_p)

    fwd = jax.jit(functools.partial(efficientnet_large_multi_forward, cfg=cfg))
    reg, cls = fwd(x, params)
    jax.block_until_ready((reg, cls))

    assert reg.shape == (2, cfg["output_dim_reg"])
    assert cls.shape == (2, cfg["output_dim_cls"])
    print("KERNEL_OK")
</pallas_src>

<mosaic_0001>
module attributes {stable_mosaic.version = 11 : i64} {
  func.func @_fused_forward_kernel(%arg0: i32, %arg1: i32, %arg2: memref<1x36x128xbf16, #tpu.memory_space<vmem>>, %arg3: memref<64x36xbf16, #tpu.memory_space<vmem>>, %arg4: memref<64x1xf32, #tpu.memory_space<vmem>>, %arg5: memref<64x1xf32, #tpu.memory_space<vmem>>, %arg6: memref<128x64xbf16, #tpu.memory_space<vmem>>, %arg7: memref<128x1xf32, #tpu.memory_space<vmem>>, %arg8: memref<128x1xf32, #tpu.memory_space<vmem>>, %arg9: memref<128x128xf32, #tpu.memory_space<vmem>>, %arg10: memref<1x128xf32, #tpu.memory_space<vmem>>, %arg11: memref<1x1x128xf32, #tpu.memory_space<vmem>>, %arg12: memref<128x1xf32, #tpu.memory_space<vmem>>) attributes {dimension_semantics = [#tpu.dimension_semantics<parallel>, #tpu.dimension_semantics<arbitrary>], iteration_bounds = array<i64: 2, 1>, scalar_prefetch = 0 : i64, scratch_operands = 1 : i64, tpu.core_type = #tpu.core_type<tc>, window_params = [{transform_indices = @transform_0, window_bounds = array<i64: 1, 36, 128>}, {pipeline_mode = #tpu.pipeline_mode<synchronous>, transform_indices = @transform_1, window_bounds = array<i64: 64, 36>}, {pipeline_mode = #tpu.pipeline_mode<synchronous>, transform_indices = @transform_2, window_bounds = array<i64: 64, 1>}, {pipeline_mode = #tpu.pipeline_mode<synchronous>, transform_indices = @transform_3, window_bounds = array<i64: 64, 1>}, {pipeline_mode = #tpu.pipeline_mode<synchronous>, transform_indices = @transform_4, window_bounds = array<i64: 128, 64>}, {pipeline_mode = #tpu.pipeline_mode<synchronous>, transform_indices = @transform_5, window_bounds = array<i64: 128, 1>}, {pipeline_mode = #tpu.pipeline_mode<synchronous>, transform_indices = @transform_6, window_bounds = array<i64: 128, 1>}, {pipeline_mode = #tpu.pipeline_mode<synchronous>, transform_indices = @transform_7, window_bounds = array<i64: 128, 128>}, {pipeline_mode = #tpu.pipeline_mode<synchronous>, transform_indices = @transform_8, window_bounds = array<i64: 1, 128>}, {transform_indices = @transform_9, window_bounds = array<i64: 1, 1, 128>}]} {
    %c0_i32 = arith.constant 0 : i32
    %0 = arith.cmpi eq, %arg1, %c0_i32 : i32
    %1 = arith.extui %0 : i1 to i32
    %c0_i32_0 = arith.constant 0 : i32
    %2 = arith.cmpi ne, %1, %c0_i32_0 : i32
    scf.if %2 {
      %cst_25 = arith.constant 0.000000e+00 : f32
      %46 = vector.broadcast %cst_25 : f32 to vector<128x1xf32>
      %c0_26 = arith.constant 0 : index
      %c0_27 = arith.constant 0 : index
      %47 = vector.load %arg12[%c0_26, %c0_27] : memref<128x1xf32, #tpu.memory_space<vmem>>, vector<128x1xf32>
      tpu.vector_store %arg12[%c0_26, %c0_27], %46 {strides = array<i32>} : memref<128x1xf32, #tpu.memory_space<vmem>>, vector<128x1xf32>,
    } else {
    }
    %c0 = arith.constant 0 : index
    %c0_1 = arith.constant 0 : index
    %c0_2 = arith.constant 0 : index
    %3 = vector.load %arg2[%c0, %c0_1, %c0_2] : memref<1x36x128xbf16, #tpu.memory_space<vmem>>, vector<1x36x128xbf16>
    %4 = vector.shape_cast %3 : vector<1x36x128xbf16> to vector<36x128xbf16>
    %c0_3 = arith.constant 0 : index
    %c0_4 = arith.constant 0 : index
    %5 = vector.load %arg3[%c0_3, %c0_4] : memref<64x36xbf16, #tpu.memory_space<vmem>>, vector<64x36xbf16>
    %cst = arith.constant dense<0.000000e+00> : vector<64x128xf32>
    %6 = tpu.matmul %5, %4, %cst {dimension_numbers = #tpu.dot_dimension_numbers<[1], [0], [0], [1], [0, 0, 1, 1], [], []>} : vector<64x36xbf16>, vector<36x128xbf16>, vector<64x128xf32> -> vector<64x128xf32>
    %c0_5 = arith.constant 0 : index
    %c0_6 = arith.constant 0 : index
    %7 = vector.load %arg4[%c0_5, %c0_6] : memref<64x1xf32, #tpu.memory_space<vmem>>, vector<64x1xf32>
    %8 = vector.broadcast %7 : vector<64x1xf32> to vector<64x128xf32>
    %9 = arith.mulf %6, %8 : vector<64x128xf32>
    %c0_7 = arith.constant 0 : index
    %c0_8 = arith.constant 0 : index
    %10 = vector.load %arg5[%c0_7, %c0_8] : memref<64x1xf32, #tpu.memory_space<vmem>>, vector<64x1xf32>
    %11 = vector.broadcast %10 : vector<64x1xf32> to vector<64x128xf32>
    %12 = arith.addf %9, %11 : vector<64x128xf32>
    %13 = arith.negf %12 : vector<64x128xf32>
    %14 = math.exp %13 : vector<64x128xf32>
    %cst_9 = arith.constant 1.000000e+00 : f32
    %15 = vector.broadcast %cst_9 : f32 to vector<64x128xf32>
    %16 = arith.addf %15, %14 : vector<64x128xf32>
    %17 = arith.divf %15, %16 : vector<64x128xf32>
    %18 = arith.mulf %12, %17 : vector<64x128xf32>
    %c0_10 = arith.constant 0 : index
    %c0_11 = arith.constant 0 : index
    %19 = vector.load %arg6[%c0_10, %c0_11] : memref<128x64xbf16, #tpu.memory_space<vmem>>, vector<128x64xbf16>
    %20 = arith.truncf %18 : vector<64x128xf32> to vector<64x128xbf16>
    %cst_12 = arith.constant dense<0.000000e+00> : vector<128x128xf32>
    %21 = tpu.matmul %19, %20, %cst_12 {dimension_numbers = #tpu.dot_dimension_numbers<[1], [0], [0], [1], [0, 0, 1, 1], [], []>} : vector<128x64xbf16>, vector<64x128xbf16>, vector<128x128xf32> -> vector<128x128xf32>
    %c0_13 = arith.constant 0 : index
    %c0_14 = arith.constant 0 : index
    %22 = vector.load %arg7[%c0_13, %c0_14] : memref<128x1xf32, #tpu.memory_space<vmem>>, vector<128x1xf32>
    %23 = vector.broadcast %22 : vector<128x1xf32> to vector<128x128xf32>
    %24 = arith.mulf %21, %23 : vector<128x128xf32>
    %c0_15 = arith.constant 0 : index
    %c0_16 = arith.constant 0 : index
    %25 = vector.load %arg8[%c0_15, %c0_16] : memref<128x1xf32, #tpu.memory_space<vmem>>, vector<128x1xf32>
    %26 = vector.broadcast %25 : vector<128x1xf32> to vector<128x128xf32>
    %27 = arith.addf %24, %26 : vector<128x128xf32>
    %28 = arith.negf %27 : vector<128x128xf32>
    %29 = math.exp %28 : vector<128x128xf32>
    %cst_17 = arith.constant 1.000000e+00 : f32
    %30 = vector.broadcast %cst_17 : f32 to vector<128x128xf32>
    %31 = arith.addf %30, %29 : vector<128x128xf32>
    %32 = arith.divf %30, %31 : vector<128x128xf32>
    %33 = arith.mulf %27, %32 : vector<128x128xf32>
    %c128_i32 = arith.constant 128 : i32
    %34 = arith.muli %arg1, %c128_i32 : i32
    %c128_i32_18 = arith.constant 128 : i32
    %35 = arith.addi %34, %c128_i32_18 : i32
    %c64_i32 = arith.constant 64 : i32
    %36 = arith.cmpi sle, %35, %c64_i32 : i32
    %37 = arith.extui %36 : i1 to i32
    %c0_i32_19 = arith.constant 0 : i32
    %38 = arith.cmpi ne, %37, %c0_i32_19 : i32
    scf.if %38 {
      %c0_25 = arith.constant 0 : index
      %c0_26 = arith.constant 0 : index
      %46 = vector.load %arg12[%c0_25, %c0_26] : memref<128x1xf32, #tpu.memory_space<vmem>>, vector<128x1xf32>
      %cst_27 = arith.constant dense<0.000000e+00> : vector<128xf32>
      %47 = vector.multi_reduction <add>, %33, %cst_27 [1] : vector<128x128xf32> to vector<128xf32>
      %48 = vector.shape_cast %47 : vector<128xf32> to vector<128x1xf32>
      %49 = arith.addf %46, %48 : vector<128x1xf32>
      %c0_28 = arith.constant 0 : index
      %c0_29 = arith.constant 0 : index
      %50 = vector.load %arg12[%c0_28, %c0_29] : memref<128x1xf32, #tpu.memory_space<vmem>>, vector<128x1xf32>
      tpu.vector_store %arg12[%c0_28, %c0_29], %49 {strides = array<i32>} : memref<128x1xf32, #tpu.memory_space<vmem>>, vector<128x1xf32>,
    } else {
    }
    %c128_i32_20 = arith.constant 128 : i32
    %39 = arith.addi %34, %c128_i32_20 : i32
    %c64_i32_21 = arith.constant 64 : i32
    %40 = arith.cmpi sgt, %39, %c64_i32_21 : i32
    %41 = arith.extui %40 : i1 to i32
    %c0_i32_22 = arith.constant 0 : i32
    %42 = arith.cmpi ne, %41, %c0_i32_22 : i32
    scf.if %42 {
      %46 = tpu.iota {dimensions = array<i32: 1>} : vector<128x128xi32>
      %47 = vector.broadcast %34 : i32 to vector<128x128xi32>
      %48 = arith.addi %47, %46 : vector<128x128xi32>
      %c64_i32_25 = arith.constant 64 : i32
      %49 = vector.broadcast %c64_i32_25 : i32 to vector<128x128xi32>
      %50 = arith.cmpi slt, %48, %49 : vector<128x128xi32>
      %cst_26 = arith.constant 0.000000e+00 : f32
      %51 = vector.broadcast %cst_26 : f32 to vector<128x128xf32>
      %52 = arith.select %50, %33, %51 : vector<128x128xi1>, vector<128x128xf32>
      %c0_27 = arith.constant 0 : index
      %c0_28 = arith.constant 0 : index
      %53 = vector.load %arg12[%c0_27, %c0_28] : memref<128x1xf32, #tpu.memory_space<vmem>>, vector<128x1xf32>
      %cst_29 = arith.constant dense<0.000000e+00> : vector<128xf32>
      %54 = vector.multi_reduction <add>, %52, %cst_29 [1] : vector<128x128xf32> to vector<128xf32>
      %55 = vector.shape_cast %54 : vector<128xf32> to vector<128x1xf32>
      %56 = arith.addf %53, %55 : vector<128x1xf32>
      %c0_30 = arith.constant 0 : index
      %c0_31 = arith.constant 0 : index
      %57 = vector.load %arg12[%c0_30, %c0_31] : memref<128x1xf32, #tpu.memory_space<vmem>>, vector<128x1xf32>
      tpu.vector_store %arg12[%c0_30, %c0_31], %56 {strides = array<i32>} : memref<128x1xf32, #tpu.memory_space<vmem>>, vector<128x1xf32>,
    } else {
    }
    %c0_i32_23 = arith.constant 0 : i32
    %43 = arith.cmpi eq, %arg1, %c0_i32_23 : i32
    %44 = arith.extui %43 : i1 to i32
    %c0_i32_24 = arith.constant 0 : i32
    %45 = arith.cmpi ne, %44, %c0_i32_24 : i32
    scf.if %45 {
      %c0_25 = arith.constant 0 : index
      %c0_26 = arith.constant 0 : index
      %46 = vector.load %arg12[%c0_25, %c0_26] : memref<128x1xf32, #tpu.memory_space<vmem>>, vector<128x1xf32>
      %cst_27 = arith.constant 1.562500e-02 : f32
      %47 = vector.broadcast %cst_27 : f32 to vector<128x1xf32>
      %48 = arith.mulf %46, %47 : vector<128x1xf32>
      %c0_28 = arith.constant 0 : index
      %c0_29 = arith.constant 0 : index
      %49 = vector.load %arg9[%c0_28, %c0_29] : memref<128x128xf32, #tpu.memory_space<vmem>>, vector<128x128xf32>
      %50 = vector.broadcast %48 : vector<128x1xf32> to vector<128x128xf32>
      %51 = arith.mulf %50, %49 : vector<128x128xf32>
      %cst_30 = arith.constant dense<0.000000e+00> : vector<128xf32>
      %52 = vector.multi_reduction <add>, %51, %cst_30 [0] : vector<128x128xf32> to vector<128xf32>
      %53 = vector.shape_cast %52 : vector<128xf32> to vector<1x128xf32>
      %c0_31 = arith.constant 0 : index
      %c0_32 = arith.constant 0 : index
      %54 = vector.load %arg10[%c0_31, %c0_32] : memref<1x128xf32, #tpu.memory_space<vmem>>, vector<1x128xf32>
      %55 = arith.addf %53, %54 : vector<1x128xf32>
      %c0_33 = arith.constant 0 : index
      %c0_34 = arith.constant 0 : index
      %c0_35 = arith.constant 0 : index
      %56 = vector.load %arg11[%c0_33, %c0_34, %c0_35] : memref<1x1x128xf32, #tpu.memory_space<vmem>>, vector<1x1x128xf32>
      %57 = vector.shape_cast %56 : vector<1x1x128xf32> to vector<1x128xf32>
      %58 = vector.shape_cast %55 : vector<1x128xf32> to vector<1x1x128xf32>
      tpu.vector_store %arg11[%c0_33, %c0_34, %c0_35], %58 {strides = array<i32>} : memref<1x1x128xf32, #tpu.memory_space<vmem>>, vector<1x1x128xf32>,
    } else {
    }
    return
  }
  func.func @transform_0(%arg0: i32, %arg1: i32) -> (i32, i32, i32) {
    %c0_i32 = arith.constant 0 : i32
    %c0_i32_0 = arith.constant 0 : i32
    return %arg0, %c0_i32, %arg1 : i32, i32, i32
  }
  func.func @transform_1(%arg0: i32, %arg1: i32) -> (i32, i32) {
    %c0_i32 = arith.constant 0 : i32
    %c0_i32_0 = arith.constant 0 : i32
    %c0_i32_1 = arith.constant 0 : i32
    return %c0_i32, %c0_i32_0 : i32, i32
  }
  func.func @transform_2(%arg0: i32, %arg1: i32) -> (i32, i32) {
    %c0_i32 = arith.constant 0 : i32
    %c0_i32_0 = arith.constant 0 : i32
    %c0_i32_1 = arith.constant 0 : i32
    return %c0_i32, %c0_i32_0 : i32, i32
  }
  func.func @transform_3(%arg0: i32, %arg1: i32) -> (i32, i32) {
    %c0_i32 = arith.constant 0 : i32
    %c0_i32_0 = arith.constant 0 : i32
    %c0_i32_1 = arith.constant 0 : i32
    return %c0_i32, %c0_i32_0 : i32, i32
  }
  func.func @transform_4(%arg0: i32, %arg1: i32) -> (i32, i32) {
    %c0_i32 = arith.constant 0 : i32
    %c0_i32_0 = arith.constant 0 : i32
    %c0_i32_1 = arith.constant 0 : i32
    return %c0_i32, %c0_i32_0 : i32, i32
  }
  func.func @transform_5(%arg0: i32, %arg1: i32) -> (i32, i32) {
    %c0_i32 = arith.constant 0 : i32
    %c0_i32_0 = arith.constant 0 : i32
    %c0_i32_1 = arith.constant 0 : i32
    return %c0_i32, %c0_i32_0 : i32, i32
  }
  func.func @transform_6(%arg0: i32, %arg1: i32) -> (i32, i32) {
    %c0_i32 = arith.constant 0 : i32
    %c0_i32_0 = arith.constant 0 : i32
    %c0_i32_1 = arith.constant 0 : i32
    return %c0_i32, %c0_i32_0 : i32, i32
  }
  func.func @transform_7(%arg0: i32, %arg1: i32) -> (i32, i32) {
    %c0_i32 = arith.constant 0 : i32
    %c0_i32_0 = arith.constant 0 : i32
    %c0_i32_1 = arith.constant 0 : i32
    return %c0_i32, %c0_i32_0 : i32, i32
  }
  func.func @transform_8(%arg0: i32, %arg1: i32) -> (i32, i32) {
    %c0_i32 = arith.constant 0 : i32
    %c0_i32_0 = arith.constant 0 : i32
    %c0_i32_1 = arith.constant 0 : i32
    return %c0_i32, %c0_i32_0 : i32, i32
  }
  func.func @transform_9(%arg0: i32, %arg1: i32) -> (i32, i32, i32) {
    %c0_i32 = arith.constant 0 : i32
    %c0_i32_0 = arith.constant 0 : i32
    %c0_i32_1 = arith.constant 0 : i32
    return %arg0, %c0_i32, %c0_i32_0 : i32, i32, i32
  }
}

</mosaic_0001>

<bundles_post_ra>
// kernel: efficientnet_large_multi_forward.1
= control target key start
LH: loop header
LB: loop body
LE: loop exit
PB: predicated region body
PF: predicated region fallthrough
CT: control target
= control target key end

     0   :  { %s1956_s30 = smov 0   ;;  %s1958_s10 = smov 0   ;;  %s2378_s0 = inlined_call_operand.vmem [shape: bf16[2,36,128], index: 0, kind: input, shape index: {}]   ;;  %s2379_s1 = inlined_call_operand.vmem [shape: bf16[64,36], index: 1, kind: input, shape index: {}]   ;;  %s2380_s2 = inlined_call_operand.vmem [shape: f32[64,1], index: 2, kind: input, shape index: {}]   ;;  %s2381_s3 = inlined_call_operand.vmem [shape: f32[64,1], index: 3, kind: input, shape index: {}]   ;;  %s2382_s4 = inlined_call_operand.vmem [shape: bf16[128,64], index: 4, kind: input, shape index: {}]   ;;  %s2383_s5 = inlined_call_operand.vmem [shape: f32[128,1], index: 5, kind: input, shape index: {}]   ;;  %s2384_s6 = inlined_call_operand.vmem [shape: f32[128,1], index: 6, kind: input, shape index: {}]   ;;  %s2385_s7 = inlined_call_operand.vmem [shape: f32[128,128], index: 7, kind: input, shape index: {}]   ;;  %s2386_s8 = inlined_call_operand.vmem [shape: f32[1,128], index: 8, kind: input, shape index: {}]   ;;  %s2387_s9 = inlined_call_operand.vmem [shape: f32[2,1,128], index: 9, kind: output, shape index: {}]  }
   0x1   :  { %s1960_s11 = smov 0  }
   0x2 LB: > { %s31_s12 = sadd.s32 1, %s1898_s10  ;;  %p1619_p0 = scmp.ge.s32.totalorder %s1902_s11, 1  ;;  %s1902_s11 = sphi %s1960_s11, %s19_s11   ;;  %s1898_s10 = sphi %s1958_s10, %s2389_s10   ;;  %s1894_s30 = sphi %s1956_s30, %s2388_s30  }
   0x3   : > { %p33_p1 = scmp.ge.s32.totalorder %s31_s12, 2  ;;  %p304_p2 = scmp.lt.s32.totalorder %s1902_s11, 3 }
   0x5   : > { %s2391_s12 = smov (%p33_p1, %s31_s12), 0  ;;  %p305_p3 = pnand %p1619_p0, %p304_p2 }
   0x6   : > { %v560_v0 = vld [vmem:[%s2381_s3] sm:$0xff] (!%p305_p3)  ;;  %p341_p4 = scmp.lt.s32.totalorder (!%p305_p3), %s1894_s30, 1  ;;  %v1904_v2 = vmov (!%p305_p3), 0   ;;  %v561_v3 = vld [vmem:[%s2381_s3 + $0x8] sm:$0xff] (!%p305_p3)  ;;  %vm422_vm0 = vcmask (!%p305_p3), 293888   ;;  %v507_v6 = vld [vmem:[%s2380_s2 + $0x18] sm:$0xff] (!%p305_p3) }
   0x7   : > { %308 = sbr.rel (%p305_p3) target bundleno = 876 (0x36c), region = 56  ;;  %v504_v1 = vld [vmem:[%s2380_s2] sm:$0xff] (!%p305_p3)  ;;  %1768 = vset.pattern.permute.xlu1 (!%p305_p3), %v1904_v2  ;;  %1767 = vset.pattern.permute.xlu0 (!%p305_p3), %v1904_v2  ;;  %v505_v4 = vld [vmem:[%s2380_s2 + $0x8] sm:$0xff] (!%p305_p3)  ;;  %v506_v7 = vld [vmem:[%s2380_s2 + $0x10] sm:$0xff] (!%p305_p3)  ;;  %vm435_vm1 = vcmask (!%p305_p3), 1041408   ;;  %vm732_vm2 = vcmask (!%p305_p3), 523264  }
   0x8   : > { %570 = vperm.xlu1 (!%p305_p3), %1768, %v560_v0   ;;  %514 = vperm.xlu0 (!%p305_p3), %1767, %v504_v1   ;;  %v1772_v5 = vld [vmem:[%s2379_s1] sm:$0xff] (!%p305_p3)   ;;  %v563_v10 = vld [vmem:[%s2381_s3 + $0x18] sm:$0xff] (!%p305_p3)  ;;  %v562_v11 = vld [vmem:[%s2381_s3 + $0x10] sm:$0xff] (!%p305_p3)  ;;  %vm357_vm3 = vcmask (!%p305_p3), 7168  }
   0x9   : > { %1699 = vmatprep.mubr.msk.bf16.mxu0 (!%p305_p3), %vm422_vm0, %v1772_v5  ;;  %v509_v13 = vld [vmem:[%s2380_s2 + $0x28] sm:$0xff] (!%p305_p3)  ;;  %v508_v14 = vld [vmem:[%s2380_s2 + $0x20] sm:$0xff] (!%p305_p3)  ;;  %v1774_v18 = vld [vmem:[%s2379_s1 + $0x10] sm:$0xff] (!%p305_p3)  }
   0xa   : > { %v1773_v16 = vld [vmem:[%s2379_s1 + $0x8] sm:$0xff] (!%p305_p3)   ;;  %v564_v19 = vld [vmem:[%s2381_s3 + $0x20] sm:$0xff] (!%p305_p3)  ;;  %v511_v20 = vld [vmem:[%s2380_s2 + $0x38] sm:$0xff] (!%p305_p3) }
   0xb   : > { %v565_v17 = vld [vmem:[%s2381_s3 + $0x28] sm:$0xff] (!%p305_p3)  ;;  %v510_v21 = vld [vmem:[%s2380_s2 + $0x30] sm:$0xff] (!%p305_p3)  ;;  %v1775_v22 = vld [vmem:[%s2379_s1 + $0x18] sm:$0xff] (!%p305_p3)  }
   0xc   : > { %575 = vperm.xlu1 (!%p305_p3), %1768, %v561_v3   ;;  %519 = vperm.xlu0 (!%p305_p3), %1767, %v505_v4   ;;  %v567_v23 = vld [vmem:[%s2381_s3 + $0x38] sm:$0xff] (!%p305_p3)  ;;  %v566_v24 = vld [vmem:[%s2381_s3 + $0x30] sm:$0xff] (!%p305_p3)  ;;  %v855_v25 = vld [vmem:[%s2383_s5 + $0x8] sm:$0xff] (!%p305_p3) }
   0xd   : > { %v854_v26 = vld [vmem:[%s2383_s5] sm:$0xff] (!%p305_p3)  ;;  %v856_v28 = vld [vmem:[%s2383_s5 + $0x10] sm:$0xff] (!%p305_p3)  ;;  %v857_v29 = vld [vmem:[%s2383_s5 + $0x18] sm:$0xff] (!%p305_p3) }
   0xe   : > { %s2393_s30 = smov (!%p341_p4, %s1894_s30), 1  ;;  %v966_v27 = vld [vmem:[%s2384_s6] sm:$0xff]  ;;  %v967_v30 = vld [vmem:[%s2384_s6 + $0x8] sm:$0xff]  ;;  %v968_v32 = vld [vmem:[%s2384_s6 + $0x10] sm:$0xff] }
   0xf   : > { %s1740_s21 = smul.u32 20, %s2393_s30  ;;  %v858_v31 = vld [vmem:[%s2383_s5 + $0x20] sm:$0xff]  ;;  %v859_v33 = vld [vmem:[%s2383_s5 + $0x28] sm:$0xff]  ;;  %v969_v34 = vld [vmem:[%s2384_s6 + $0x18] sm:$0xff]  ;;  %s351_s20 = scalar_lea.vmem %s2387_s9, %s2393_s30 }
  0x10   : > { %529 = vperm.xlu1 %1768, %v507_v6   ;;  %524 = vperm.xlu0 %1767, %v506_v7   ;;  %v860_v35 = vld [vmem:[%s2383_s5 + $0x30] sm:$0xff]  ;;  %v970_v36 = vld [vmem:[%s2384_s6 + $0x20] sm:$0xff]  ;;  %v861_v37 = vld [vmem:[%s2383_s5 + $0x38] sm:$0xff] }
  0x11   : > { %s348_s26 = scalar_lea.vmem %s2378_s0, %s1740_s21  ;;  %v971_v38 = vld [vmem:[%s2384_s6 + $0x28] sm:$0xff]  ;;  %v862_v39 = vld [vmem:[%s2383_s5 + $0x40] sm:$0xff]  ;;  %v972_v40 = vld [vmem:[%s2384_s6 + $0x30] sm:$0xff] }
  0x12   : > { %v1769_v8 = vld [vmem:[%s348_s26] sm:$0xff]   ;;  %v1770_v9 = vld [vmem:[%s348_s26 + $0x8] sm:$0xff]   ;;  %v1771_v12 = vld [vmem:[%s348_s26 + $0x10] ss:$0 sps:$4 sm:$0x33]  }
  0x13   : > { %1693 = vmatprep.subr.bf16.mxu0 %v1769_v8  ;;  %v437_v15 = vsel %vm435_vm1, %v1771_v12, 0  ;;  %v863_v41 = vld [vmem:[%s2383_s5 + $0x48] sm:$0xff]  ;;  %v973_v42 = vld [vmem:[%s2384_s6 + $0x38] sm:$0xff]  ;;  %v864_v43 = vld [vmem:[%s2383_s5 + $0x50] sm:$0xff] }
  0x14   : > { %1694 = vmatpush3.bf16.msra.mxu0 %v1769_v8  ;;  %585 = vperm.xlu1 %1768, %v563_v10   ;;  %v974_v44 = vld [vmem:[%s2384_s6 + $0x40] sm:$0xff]  ;;  %v865_v45 = vld [vmem:[%s2383_s5 + $0x58] sm:$0xff]  ;;  %v975_v46 = vld [vmem:[%s2384_s6 + $0x48] sm:$0xff] }
  0x15   : > { %1695 = vmatprep.subr.bf16.mxu0 %v1770_v9  ;;  %580 = vperm.xlu0 %1767, %v562_v11   ;;  %v866_v47 = vld [vmem:[%s2383_s5 + $0x60] sm:$0xff]  ;;  %v976_v48 = vld [vmem:[%s2384_s6 + $0x50] sm:$0xff]  ;;  %v867_v49 = vld [vmem:[%s2383_s5 + $0x68] sm:$0xff] }
  0x16   : > { %v977_v50 = vld [vmem:[%s2384_s6 + $0x58] sm:$0xff]  ;;  %v868_v51 = vld [vmem:[%s2383_s5 + $0x70] sm:$0xff]  ;;  %v978_v52 = vld [vmem:[%s2384_s6 + $0x60] sm:$0xff] }
  0x17   : > { %v869_v53 = vld [vmem:[%s2383_s5 + $0x78] sm:$0xff]  ;;  %v979_v54 = vld [vmem:[%s2384_s6 + $0x68] sm:$0xff]  ;;  %v980_v56 = vld [vmem:[%s2384_s6 + $0x70] sm:$0xff] }
  0x18   : > { %1696 = vmatpush3.bf16.msra.mxu0 %v1770_v9  ;;  %539 = vperm.xlu1 %1768, %v509_v13   ;;  %v981_v55 = vld [vmem:[%s2384_s6 + $0x78] sm:$0xff]  ;;  %v1776_v57 = vld [vmem:[%s2382_s4] sm:$0xff]   ;;  %v1777_v58 = vld [vmem:[%s2382_s4 + $0x10] sm:$0xff]  }
  0x19   : > { %1739 = vmatprep.subr.msk.bf16.mxu0 %vm435_vm1, %v1771_v12  ;;  %534 = vperm.xlu0 %1767, %v508_v14  }
  0x1a   : > { %1719 = vmatprep.mubr.msk.bf16.mxu1 %vm732_vm2, %v1777_v58 }
  0x1c   : > { %1698 = vmatpush3.bf16.msra.mxu0 %v437_v15  ;;  %595 = vperm.xlu1 %1768, %v565_v17  }
  0x1d   : > { %590 = vperm.xlu0 %1767, %v564_v19  }
  0x1f   : > { %1700 = vmatmul.mubr.msk.bf16.vlgmr.msra.gmra.mrb[0].mxu0 %vm422_vm0, %v1773_v16 }
  0x20   : > { %1703 = vmatprep.mubr.msk.bf16.mxu0 %vm422_vm0, %v1774_v18  ;;  %549 = vperm.xlu1 %1768, %v511_v20  }
  0x21   : > { %544 = vperm.xlu0 %1767, %v510_v21  }
  0x24   : > { %605 = vperm.xlu1 %1768, %v567_v23  }
  0x25   : > { %600 = vperm.xlu0 %1767, %v566_v24  }
  0x27   : > { %1704 = vmatmul.mubr.msk.bf16.gmra.mrb[4].mxu0 %vm422_vm0, %v1775_v22 }
  0x28   : > { %877 = vperm.xlu1 %1768, %v855_v25   ;;  %1715 = vmatprep.mubr.msk.bf16.mxu0 %vm732_vm2, %v1776_v57 }
  0x29   : > { %872 = vperm.xlu0 %1767, %v854_v26  }
  0x2c   : > { %984 = vperm.xlu1 %1768, %v966_v27  }
  0x2d   : > { %882 = vperm.xlu0 %1767, %v856_v28  }
  0x30   : > { %887 = vperm.xlu1 %1768, %v857_v29  }
  0x31   : > { %989 = vperm.xlu0 %1767, %v967_v30  }
  0x34   : > { %892 = vperm.xlu1 %1768, %v858_v31  }
  0x35   : > { %994 = vperm.xlu0 %1767, %v968_v32  }
  0x38   : > { %897 = vperm.xlu1 %1768, %v859_v33  }
  0x39   : > { %999 = vperm.xlu0 %1767, %v969_v34  }
  0x3c   : > { %902 = vperm.xlu1 %1768, %v860_v35  }
  0x3d   : > { %1004 = vperm.xlu0 %1767, %v970_v36  }
  0x40   : > { %907 = vperm.xlu1 %1768, %v861_v37  }
  0x41   : > { %1009 = vperm.xlu0 %1767, %v971_v38  }
  0x44   : > { %912 = vperm.xlu1 %1768, %v862_v39  }
  0x45   : > { %1014 = vperm.xlu0 %1767, %v972_v40  }
  0x48   : > { %917 = vperm.xlu1 %1768, %v863_v41  }
  0x49   : > { %1019 = vperm.xlu0 %1767, %v973_v42  }
  0x4c   : > { %922 = vperm.xlu1 %1768, %v864_v43  }
  0x4d   : > { %1024 = vperm.xlu0 %1767, %v974_v44  }
  0x50   : > { %927 = vperm.xlu1 %1768, %v865_v45  }
  0x51   : > { %1029 = vperm.xlu0 %1767, %v975_v46  }
  0x54   : > { %932 = vperm.xlu1 %1768, %v866_v47  }
  0x55   : > { %1034 = vperm.xlu0 %1767, %v976_v48  }
  0x58   : > { %937 = vperm.xlu1 %1768, %v867_v49  }
  0x59   : > { %1039 = vperm.xlu0 %1767, %v977_v50  }
  0x5c   : > { %942 = vperm.xlu1 %1768, %v868_v51  }
  0x5d   : > { %1044 = vperm.xlu0 %1767, %v978_v52  }
  0x60   : > { %947 = vperm.xlu1 %1768, %v869_v53  }
  0x61   : > { %1049 = vperm.xlu0 %1767, %v979_v54  }
  0x64   : > { %1059 = vperm.xlu1 %1768, %v981_v55  }
  0x65   : > { %1054 = vperm.xlu0 %1767, %v980_v56  }
  0x87   : > { %v515_v59 = vpop.permute.xlu0 %514  ;;  %v571_v60 = vpop.permute.xlu1 %570 }
  0x8b   : > { %v520_v61 = vpop.permute.xlu0 %519  ;;  %v576_v62 = vpop.permute.xlu1 %575 }
  0x8f   : > { %v525_v63 = vpop.permute.xlu0 %524  ;;  %v530_v0 = vpop.permute.xlu1 %529 }
  0x93   : > { %v586_v2 = vpop.permute.xlu1 %585 }
  0x94   : > { %v581_v1 = vpop.permute.xlu0 %580 }
  0x97   : > { %v540_v4 = vpop.permute.xlu1 %539 }
  0x98   : > { %v535_v3 = vpop.permute.xlu0 %534 }
  0x9b   : > { %v596_v6 = vpop.permute.xlu1 %595 }
  0x9c   : > { %v591_v5 = vpop.permute.xlu0 %590 }
  0x9f   : > { %v550_v20 = vpop.permute.xlu1 %549 }
  0xa0   : > { %v545_v15 = vpop.permute.xlu0 %544 }
  0xa3   : > { %v606_v34 = vpop.permute.xlu1 %605 }
  0xa4   : > { %v601_v28 = vpop.permute.xlu0 %600 }
  0xf2   : > { %v1701_v7 = vpop.f32.mrb[0].mxu0 }
  0xf3   : > { %v554_v8 = vmul.f32 %v1701_v7, %v525_v63  ;;  %v473_v9 = vpop.f32.mrb[1].mxu0 }
  0xf4   : > { %v552_v10 = vmul.f32 %v515_v59, %v473_v9  ;;  %v1702_v11 = vpop.f32.mrb[2].mxu0 }
  0xf5   : > { %v2148_v12 = vadd.f32 %v581_v1, %v554_v8  ;;  %v555_v13 = vmul.f32 %v1702_v11, %v530_v0  ;;  %v476_v14 = vpop.f32.mrb[3].mxu0 }
  0xf6   : > { %v2150_v16 = vadd.f32 %v571_v60, %v552_v10  ;;  %v553_v17 = vmul.f32 %v520_v61, %v476_v14 }
  0xf7   : > { %v1634_v18 = vmul.f32 -1.442695, %v2148_v12  ;;  %v611_v19 = vadd.f32 %v586_v2, %v555_v13 }
  0xf8   : > { %v1632_v21 = vmul.f32 -1.442695, %v2150_v16  ;;  %v609_v22 = vadd.f32 %v576_v62, %v553_v17  ;;  %v1780_v17 = vld [vmem:[%s2382_s4 + $0x20] sm:$0xff]  }
  0xf9   : > { %1784 = vpow2.f32 %v1634_v18  ;;  %v1635_v23 = vmul.f32 -1.442695, %v611_v19  ;;  %v1781_v18 = vld [vmem:[%s2382_s4 + $0x28] sm:$0xff]  }
  0xfa   : > { %1786 = vpow2.f32 %v1632_v21  ;;  %v1633_v24 = vmul.f32 -1.442695, %v609_v22  ;;  %v1705_v25 = vpop.f32.mrb[4].mxu0  ;;  %v878_v21 = vpop.permute.xlu1 %877 }
  0xfb   : > { %1788 = vpow2.f32 %v1635_v23  ;;  %v558_v26 = vmul.f32 %v1705_v25, %v545_v15  ;;  %v489_v27 = vpop.f32.mrb[5].mxu0  ;;  %v1778_v15 = vld [vmem:[%s2382_s4 + $0x8] sm:$0xff]   ;;  %v1905_v25 = vmov 0.0  }
  0xfc   : > { %1790 = vpow2.f32 %v1633_v24  ;;  %v556_v29 = vmul.f32 %v535_v3, %v489_v27  ;;  %v1706_v30 = vpop.f32.mrb[6].mxu0  ;;  %358 = vst.msk [vmem:[#allocation2] sm:$0xff] %vm357_vm3, %v1905_v25  ;;  %359 = vst.msk [vmem:[#allocation2 + $0x8] sm:$0xff] %vm357_vm3, %v1905_v25 }
  0xfd   : > { %v614_v31 = vadd.f32 %v601_v28, %v558_v26  ;;  %v559_v32 = vmul.f32 %v1706_v30, %v550_v20  ;;  %v492_v33 = vpop.f32.mrb[7].mxu0  ;;  %v1783_v20 = vld [vmem:[%s2382_s4 + $0x38] sm:$0xff]   ;;  %360 = vst.msk [vmem:[#allocation2 + $0x10] sm:$0xff] %vm357_vm3, %v1905_v25  ;;  %361 = vst.msk [vmem:[#allocation2 + $0x18] sm:$0xff] %vm357_vm3, %v1905_v25 }
  0xfe   : > { %v612_v35 = vadd.f32 %v591_v5, %v556_v29  ;;  %v557_v36 = vmul.f32 %v540_v4, %v492_v33  ;;  %v985_v23 = vpop.permute.xlu1 %984  ;;  %362 = vst.msk [vmem:[#allocation2 + $0x20] sm:$0xff] %vm357_vm3, %v1905_v25  ;;  %363 = vst.msk [vmem:[#allocation2 + $0x28] sm:$0xff] %vm357_vm3, %v1905_v25 }
  0xff   : > { %v1638_v37 = vmul.f32 -1.442695, %v614_v31  ;;  %v615_v38 = vadd.f32 %v606_v34, %v559_v32  ;;  %364 = vst.msk [vmem:[#allocation2 + $0x30] sm:$0xff] %vm357_vm3, %v1905_v25  ;;  %365 = vst.msk [vmem:[#allocation2 + $0x38] sm:$0xff] %vm357_vm3, %v1905_v25 }
 0x100   : > { %v1636_v39 = vmul.f32 -1.442695, %v612_v35  ;;  %v613_v40 = vadd.f32 %v596_v6, %v557_v36  ;;  %366 = vst.msk [vmem:[#allocation2 + $0x40] sm:$0xff] %vm357_vm3, %v1905_v25  ;;  %367 = vst.msk [vmem:[#allocation2 + $0x48] sm:$0xff] %vm357_vm3, %v1905_v25 }
 0x101   : > { %1792 = vpow2.f32 %v1638_v37  ;;  %v1639_v41 = vmul.f32 -1.442695, %v615_v38  ;;  %368 = vst.msk [vmem:[#allocation2 + $0x50] sm:$0xff] %vm357_vm3, %v1905_v25  ;;  %369 = vst.msk [vmem:[#allocation2 + $0x58] sm:$0xff] %vm357_vm3, %v1905_v25 }
 0x102   : > { %1794 = vpow2.f32 %v1636_v39  ;;  %v1637_v42 = vmul.f32 -1.442695, %v613_v40  ;;  %370 = vst.msk [vmem:[#allocation2 + $0x60] sm:$0xff] %vm357_vm3, %v1905_v25  ;;  %371 = vst.msk [vmem:[#allocation2 + $0x68] sm:$0xff] %vm357_vm3, %v1905_v25  ;;  %v888_v26 = vpop.permute.xlu1 %887 }
 0x103   : > { %v1785_v43 = vpop.eup %1784  ;;  %1796 = vpow2.f32 %v1639_v41  ;;  %372 = vst.msk [vmem:[#allocation2 + $0x70] sm:$0xff] %vm357_vm3, %v1905_v25  ;;  %373 = vst.msk [vmem:[#allocation2 + $0x78] sm:$0xff] %vm357_vm3, %v1905_v25 }
 0x104   : > { %v1787_v44 = vpop.eup %1786  ;;  %v642_v45 = vadd.f32 1.0, %v1785_v43  ;;  %1798 = vpow2.f32 %v1637_v42 }
 0x105   : > { %v1789_v46 = vpop.eup %1788  ;;  %v640_v47 = vadd.f32 1.0, %v1787_v44 }
 0x106   : > { %v1791_v48 = vpop.eup %1790  ;;  %1800 = vrcp.f32 %v642_v45  ;;  %v643_v49 = vadd.f32 1.0, %v1789_v46  ;;  %v893_v28 = vpop.permute.xlu1 %892 }
 0x107   : > { %1802 = vrcp.f32 %v640_v47  ;;  %v641_v50 = vadd.f32 1.0, %v1791_v48 }
 0x108   : > { %1804 = vrcp.f32 %v643_v49 }
 0x109   : > { %1806 = vrcp.f32 %v641_v50 }
 0x10a   : > { %v898_v30 = vpop.permute.xlu1 %897 }
 0x10b   : > { %v1793_v51 = vpop.eup %1792 }
 0x10c   : > { %v1795_v52 = vpop.eup %1794  ;;  %v646_v53 = vadd.f32 1.0, %v1793_v51 }
 0x10d   : > { %v1797_v54 = vpop.eup %1796  ;;  %v644_v55 = vadd.f32 1.0, %v1795_v52 }
 0x10e   : > { %v1799_v56 = vpop.eup %1798  ;;  %1808 = vrcp.f32 %v646_v53  ;;  %v647_v57 = vadd.f32 1.0, %v1797_v54  ;;  %v903_v32 = vpop.permute.xlu1 %902 }
 0x10f   : > { %1810 = vrcp.f32 %v644_v55  ;;  %v645_v58 = vadd.f32 1.0, %v1799_v56 }
 0x110   : > { %v1801_v59 = vpop.eup %1800  ;;  %1812 = vrcp.f32 %v647_v57 }
 0x111   : > { %v1803_v60 = vpop.eup %1802  ;;  %1814 = vrcp.f32 %v645_v58  ;;  %v666_v63 = vmul.f32 %v1801_v59, %v2148_v12 }
 0x112   : > { %v1805_v61 = vpop.eup %1804  ;;  %v664_v1 = vmul.f32 %v1803_v60, %v2150_v16  ;;  %v1779_v16 = vld [vmem:[%s2382_s4 + $0x18] sm:$0xff]   ;;  %v908_v34 = vpop.permute.xlu1 %907 }
 0x113   : > { %v1807_v62 = vpop.eup %1806  ;;  %v667_v0 = vmul.f32 %v1805_v61, %v611_v19  ;;  %v1782_v19 = vld [vmem:[%s2382_s4 + $0x30] sm:$0xff]  }
 0x114   : > { %v665_v2 = vmul.f32 %v1807_v62, %v609_v22  ;;  %v873_v22 = vpop.permute.xlu0 %872 }
 0x115   : > { %v689_v3 = vpack.c.bf16 %v667_v0, %v666_v63 }
 0x116   : > { %v688_v4 = vpack.c.bf16 %v665_v2, %v664_v1  ;;  %v913_v36 = vpop.permute.xlu1 %912 }
 0x118   : > { %v1809_v5 = vpop.eup %1808  ;;  %1707 = vmatprep.subr.bf16.mxu0 %v688_v4  ;;  %1731 = vmatprep.subr.bf16.mxu1 %v688_v4  ;;  %v883_v24 = vpop.permute.xlu0 %882 }
 0x119   : > { %v1811_v6 = vpop.eup %1810  ;;  %1708 = vmatpush3.bf16.msra.mxu0 %v688_v4  ;;  %1735 = vmatpush3.bf16.msra.mxu1 %v688_v4  ;;  %v670_v9 = vmul.f32 %v1809_v5, %v614_v31 }
 0x11a   : > { %v1813_v7 = vpop.eup %1812  ;;  %1709 = vmatprep.subr.bf16.mxu0 %v689_v3  ;;  %1732 = vmatprep.subr.bf16.mxu1 %v689_v3  ;;  %v668_v11 = vmul.f32 %v1811_v6, %v612_v35 }
 0x11b   : > { %v1815_v8 = vpop.eup %1814  ;;  %v671_v10 = vmul.f32 %v1813_v7, %v615_v38  ;;  %v918_v38 = vpop.permute.xlu1 %917 }
 0x11c   : > { %v669_v12 = vmul.f32 %v1815_v8, %v613_v40  ;;  %v990_v27 = vpop.permute.xlu0 %989 }
 0x11d   : > { %v691_v13 = vpack.c.bf16 %v671_v10, %v670_v9  ;;  %1710 = vmatpush3.bf16.msra.mxu0 %v689_v3  ;;  %1736 = vmatpush3.bf16.msra.mxu1 %v689_v3 }
 0x11e   : > { %v690_v14 = vpack.c.bf16 %v669_v12, %v668_v11 }
 0x11f   : > { %v923_v40 = vpop.permute.xlu1 %922 }
 0x120   : > { %1711 = vmatprep.subr.bf16.mxu0 %v690_v14  ;;  %1733 = vmatprep.subr.bf16.mxu1 %v690_v14  ;;  %v995_v29 = vpop.permute.xlu0 %994 }
 0x121   : > { %1712 = vmatpush3.bf16.msra.mxu0 %v690_v14  ;;  %1737 = vmatpush3.bf16.msra.mxu1 %v690_v14 }
 0x122   : > { %1713 = vmatprep.subr.bf16.mxu0 %v691_v13  ;;  %1734 = vmatprep.subr.bf16.mxu1 %v691_v13 }
 0x123   : > { %v928_v42 = vpop.permute.xlu1 %927 }
 0x124   : > { %v1000_v31 = vpop.permute.xlu0 %999 }
 0x125   : > { %1714 = vmatpush3.bf16.msra.mxu0 %v691_v13  ;;  %1738 = vmatpush3.bf16.msra.mxu1 %v691_v13 }
 0x127   : > { %v2196_v44 = vpop.permute.xlu1 %932 }
 0x128   : > { %1716 = vmatmul.mubr.msk.bf16.vlgmr.msra.gmra.mrb[8].mxu0 %vm732_vm2, %v1778_v15  ;;  %1720 = vmatmul.mubr.msk.bf16.vlgmr.msra.gmra.mrb[0].mxu1 %vm732_vm2, %v1779_v16  ;;  %v1005_v33 = vpop.permute.xlu0 %1004 }
 0x129   : > { %1723 = vmatprep.mubr.msk.bf16.mxu1 %vm732_vm2, %v1780_v17 }
 0x12b   : > { %v938_v11 = vpop.permute.xlu1 %937 }
 0x12c   : > { %v1010_v35 = vpop.permute.xlu0 %1009 }
 0x130   : > { %1724 = vmatmul.mubr.msk.bf16.gmra.mrb[4].mxu1 %vm732_vm2, %v1781_v18  ;;  %v1015_v37 = vpop.permute.xlu0 %1014 }
 0x131   : > { %1727 = vmatprep.mubr.msk.bf16.mxu1 %vm732_vm2, %v1782_v19 }
 0x134   : > { %v1020_v39 = vpop.permute.xlu0 %1019 }
 0x138   : > { %1728 = vmatmul.mubr.msk.bf16.gmra.mrb[8].mxu1 %vm732_vm2, %v1783_v20  ;;  %v1025_v41 = vpop.permute.xlu0 %1024 }
 0x13c   : > { %v1030_v43 = vpop.permute.xlu0 %1029 }
 0x140   : > { %v1035_v45 = vpop.permute.xlu0 %1034 }
 0x144   : > { %v1040_v2 = vpop.permute.xlu0 %1039 }
 0x1fb   : > { %v1717_v46 = vpop.f32.mrb[8].mxu0  ;;  %v1721_v47 = vpop.f32.mrb[0].mxu1 }
 0x1fc   : > { %v952_v48 = vmul.f32 %v1717_v46, %v883_v24  ;;  %v956_v49 = vmul.f32 %v1721_v47, %v903_v32  ;;  %v791_v50 = vpop.f32.mrb[9].mxu0  ;;  %v807_v51 = vpop.f32.mrb[1].mxu1 }
 0x1fd   : > { %v950_v52 = vmul.f32 %v873_v22, %v791_v50  ;;  %v954_v53 = vmul.f32 %v893_v28, %v807_v51  ;;  %v1718_v54 = vpop.f32.mrb[10].mxu0  ;;  %v1722_v55 = vpop.f32.mrb[2].mxu1 }
 0x1fe   : > { %v2198_v56 = vadd.f32 %v995_v29, %v952_v48  ;;  %v2200_v57 = vadd.f32 %v1015_v37, %v956_v49  ;;  %v953_v58 = vmul.f32 %v1718_v54, %v888_v26  ;;  %v957_v59 = vmul.f32 %v1722_v55, %v908_v34  ;;  %v794_v60 = vpop.f32.mrb[11].mxu0  ;;  %v810_v61 = vpop.f32.mrb[3].mxu1 }
 0x1ff   : > { %v2202_v62 = vadd.f32 %v985_v23, %v950_v52  ;;  %v2204_v63 = vadd.f32 %v1005_v33, %v954_v53  ;;  %v951_v0 = vmul.f32 %v878_v21, %v794_v60  ;;  %v955_v1 = vmul.f32 %v898_v30, %v810_v61  ;;  %v1045_v21 = vpop.permute.xlu0 %1044 }
 0x200   : > { %v1658_v3 = vmul.f32 -1.442695, %v2198_v56  ;;  %v1662_v4 = vmul.f32 -1.442695, %v2200_v57  ;;  %v2208_v5 = vadd.f32 %v1000_v31, %v953_v58  ;;  %v2210_v6 = vadd.f32 %v1020_v39, %v957_v59 }
 0x201   : > { %v1656_v7 = vmul.f32 -1.442695, %v2202_v62  ;;  %v1660_v8 = vmul.f32 -1.442695, %v2204_v63  ;;  %v2214_v9 = vadd.f32 %v990_v27, %v951_v0  ;;  %v2216_v10 = vadd.f32 %v1010_v35, %v955_v1  ;;  %v943_v27 = vpop.permute.xlu1 %942 }
 0x202   : > { %1816 = vpow2.f32 %v1658_v3  ;;  %v1659_v12 = vmul.f32 -1.442695, %v2208_v5  ;;  %v1663_v13 = vmul.f32 -1.442695, %v2210_v6  ;;  %v1281_v59 = vlaneseq }
 0x203   : > { %1818 = vpow2.f32 %v1662_v4  ;;  %v1725_v14 = vpop.f32.mrb[4].mxu1  ;;  %v1657_v15 = vmul.f32 -1.442695, %v2214_v9  ;;  %v1661_v18 = vmul.f32 -1.442695, %v2216_v10  ;;  %v1050_v35 = vpop.permute.xlu0 %1049 }
 0x204   : > { %1820 = vpow2.f32 %v1656_v7  ;;  %v960_v16 = vmul.f32 %v1725_v14, %v923_v40  ;;  %v823_v17 = vpop.f32.mrb[5].mxu1  ;;  %v2244_v14 = vand.u32 127, %v1281_v59 }
 0x205   : > { %1822 = vpow2.f32 %v1660_v8  ;;  %v958_v19 = vmul.f32 %v913_v36, %v823_v17  ;;  %v1726_v20 = vpop.f32.mrb[6].mxu1 }
 0x206   : > { %1824 = vpow2.f32 %v1659_v12  ;;  %v2222_v22 = vadd.f32 %v1035_v45, %v960_v16  ;;  %v961_v23 = vmul.f32 %v1726_v20, %v928_v42  ;;  %v826_v24 = vpop.f32.mrb[7].mxu1  ;;  %vm1285_vm4 = vcmp.lt.s32.totalorder %v2244_v14, 64 }
 0x207   : > { %1826 = vpow2.f32 %v1663_v13  ;;  %v2224_v25 = vadd.f32 %v1025_v41, %v958_v19  ;;  %v959_v26 = vmul.f32 %v918_v38, %v826_v24  ;;  %v948_v41 = vpop.permute.xlu1 %947  ;;  %v1055_v55 = vpop.permute.xlu0 %1054 }
 0x208   : > { %1828 = vpow2.f32 %v1657_v15  ;;  %v1666_v30 = vmul.f32 -1.442695, %v2222_v22  ;;  %v2230_v31 = vadd.f32 %v1040_v2, %v961_v23 }
 0x209   : > { %1830 = vpow2.f32 %v1661_v18  ;;  %v1664_v28 = vmul.f32 -1.442695, %v2224_v25  ;;  %v2227_v29 = vadd.f32 %v1030_v43, %v959_v26 }
 0x20a   : > { %v1667_v42 = vmul.f32 -1.442695, %v2230_v31 }
 0x20b   : > { %1832 = vpow2.f32 %v1664_v28  ;;  %v1665_v32 = vmul.f32 -1.442695, %v2227_v29  ;;  %v1729_v33 = vpop.f32.mrb[8].mxu1  ;;  %v1060_v2 = vpop.permute.xlu1 %1059 }
 0x20c   : > { %v1817_v34 = vpop.eup %1816  ;;  %v839_v36 = vpop.f32.mrb[9].mxu1  ;;  %1834 = vpow2.f32 %v1666_v30  ;;  %v964_v47 = vmul.f32 %v1729_v33, %v943_v27 }
 0x20d   : > { %v1819_v37 = vpop.eup %1818  ;;  %v1128_v38 = vadd.f32 1.0, %v1817_v34  ;;  %v1730_v39 = vpop.f32.mrb[10].mxu1  ;;  %1836 = vpow2.f32 %v1665_v32  ;;  %v962_v50 = vmul.f32 %v2196_v44, %v839_v36 }
 0x20e   : > { %v1821_v40 = vpop.eup %1820  ;;  %v842_v43 = vpop.f32.mrb[11].mxu1  ;;  %v965_v53 = vmul.f32 %v1730_v39, %v948_v41  ;;  %v1132_v61 = vadd.f32 1.0, %v1819_v37  ;;  %v2235_v1 = vadd.f32 %v1055_v55, %v964_v47 }
 0x20f   : > { %v1823_v45 = vpop.eup %1822  ;;  %v1126_v46 = vadd.f32 1.0, %v1821_v40  ;;  %1838 = vrcp.f32 %v1128_v38  ;;  %v963_v58 = vmul.f32 %v938_v11, %v842_v43  ;;  %v2237_v4 = vadd.f32 %v1045_v21, %v962_v50 }
 0x210   : > { %v1825_v48 = vpop.eup %1824  ;;  %v1130_v49 = vadd.f32 1.0, %v1823_v45  ;;  %v2239_v8 = vadd.f32 %v1060_v2, %v965_v53  ;;  %v1670_v11 = vmul.f32 -1.442695, %v2235_v1 }
 0x211   : > { %v1827_v51 = vpop.eup %1826  ;;  %1840 = vrcp.f32 %v1126_v46  ;;  %v1129_v52 = vadd.f32 1.0, %v1825_v48  ;;  %v2241_v13 = vadd.f32 %v1050_v35, %v963_v58  ;;  %v1668_v16 = vmul.f32 -1.442695, %v2237_v4 }
 0x212   : > { %v1829_v54 = vpop.eup %1828  ;;  %1842 = vpow2.f32 %v1667_v42  ;;  %v1133_v3 = vadd.f32 1.0, %v1827_v51  ;;  %v1671_v18 = vmul.f32 -1.442695, %v2239_v8 }
 0x213   : > { %v1831_v60 = vpop.eup %1830  ;;  %1844 = vrcp.f32 %v1130_v49  ;;  %v1127_v0 = vadd.f32 1.0, %v1829_v54  ;;  %v1669_v20 = vmul.f32 -1.442695, %v2241_v13 }
 0x214   : > { %1846 = vrcp.f32 %v1129_v52  ;;  %v1131_v7 = vadd.f32 1.0, %v1831_v60 }
 0x215   : > { %v1833_v44 = vpop.eup %1832  ;;  %1848 = vrcp.f32 %v1127_v0 }
 0x216   : > { %v1134_v12 = vadd.f32 1.0, %v1833_v44  ;;  %1850 = vrcp.f32 %v1132_v61  ;;  %v1835_v15 = vpop.eup %1834 }
 0x217   : > { %1852 = vrcp.f32 %v1133_v3  ;;  %v1837_v17 = vpop.eup %1836  ;;  %v1136_v24 = vadd.f32 1.0, %v1835_v15 }
 0x218   : > { %1854 = vrcp.f32 %v1131_v7  ;;  %v1135_v28 = vadd.f32 1.0, %v1837_v17 }
 0x219   : > { %v1839_v19 = vpop.eup %1838  ;;  %1856 = vrcp.f32 %v1134_v12 }
 0x21a   : > { %1858 = vpow2.f32 %v1670_v11  ;;  %v1176_v33 = vmul.f32 %v1839_v19, %v2198_v56 }
 0x21b   : > { %v1841_v21 = vpop.eup %1840  ;;  %1860 = vpow2.f32 %v1668_v16 }
 0x21c   : > { %v1843_v23 = vpop.eup %1842  ;;  %v1174_v26 = vmul.f32 %v1841_v21, %v2202_v62  ;;  %1862 = vpow2.f32 %v1671_v18  ;;  %v1288_v39 = vsel %vm1285_vm4, %v1176_v33, 0.0  ;;  %v1303_v21 = vld [vmem:[#allocation2 + $0x8] sm:$0xff] }
 0x21d   : > { %v1845_v27 = vpop.eup %1844  ;;  %1864 = vpow2.f32 %v1669_v20  ;;  %v1137_v37 = vadd.f32 1.0, %v1843_v23  ;;  %v1304_v23 = vld [vmem:[#allocation2 + $0x10] sm:$0xff] }
 0x21e   : > { %v1847_v30 = vpop.eup %1846  ;;  %v1286_v32 = vsel %vm1285_vm4, %v1174_v26, 0.0  ;;  %1866 = vrcp.f32 %v1136_v24  ;;  %v1178_v40 = vmul.f32 %v1845_v27, %v2204_v63 }
 0x21f   : > { %v1849_v34 = vpop.eup %1848  ;;  %1318 = vadd.xlane.f32.xlu0 %v1286_v32  ;;  %1868 = vrcp.f32 %v1135_v28  ;;  %v1177_v41 = vmul.f32 %v1847_v30, %v2208_v5  ;;  %v1306_v30 = vld [vmem:[#allocation2 + $0x20] sm:$0xff]  ;;  %v1305_v32 = vld [vmem:[#allocation2 + $0x18] sm:$0xff] }
 0x220   : > { %v1175_v35 = vmul.f32 %v1849_v34, %v2214_v9  ;;  %v1851_v36 = vpop.eup %1850  ;;  %1870 = vrcp.f32 %v1137_v37  ;;  %v1290_v47 = vsel %vm1285_vm4, %v1178_v40, 0.0 }
 0x221   : > { %v1853_v38 = vpop.eup %1852  ;;  %v1180_v9 = vmul.f32 %v1851_v36, %v2200_v57  ;;  %v1289_v48 = vsel %vm1285_vm4, %v1177_v41, 0.0  ;;  %v1307_v36 = vld [vmem:[#allocation2 + $0x28] sm:$0xff] }
 0x222   : > { %v1287_v62 = vsel %vm1285_vm4, %v1175_v35, 0.0  ;;  %v1855_v56 = vpop.eup %1854  ;;  %v1308_v35 = vld [vmem:[#allocation2 + $0x30] sm:$0xff] }
 0x223   : > { %1320 = vadd.xlane.f32.xlu1 %v1287_v62  ;;  %1322 = vadd.xlane.f32.xlu0 %v1288_v39  ;;  %v1857_v42 = vpop.eup %1856  ;;  %v1179_v63 = vmul.f32 %v1855_v56, %v2216_v10  ;;  %v1292_v53 = vsel %vm1285_vm4, %v1180_v9, 0.0  ;;  %v1181_v10 = vmul.f32 %v1853_v38, %v2210_v6  ;;  %v1310_v56 = vld [vmem:[#allocation2 + $0x40] sm:$0xff] }
 0x224   : > { %v1859_v43 = vpop.eup %1858  ;;  %v1182_v55 = vmul.f32 %v1857_v42, %v2224_v25 }
 0x225   : > { %v1861_v45 = vpop.eup %1860  ;;  %v1140_v46 = vadd.f32 1.0, %v1859_v43  ;;  %v1291_v54 = vsel %vm1285_vm4, %v1179_v63, 0.0  ;;  %v1293_v60 = vsel %vm1285_vm4, %v1181_v10, 0.0  ;;  %v1309_v43 = vld [vmem:[#allocation2 + $0x38] sm:$0xff] }
 0x226   : > { %v1863_v49 = vpop.eup %1862  ;;  %v1138_v5 = vadd.f32 1.0, %v1861_v45  ;;  %v1294_v59 = vsel %vm1285_vm4, %v1182_v55, 0.0 }
 0x227   : > { %1326 = vadd.xlane.f32.xlu1 %v1290_v47  ;;  %1324 = vadd.xlane.f32.xlu0 %v1289_v48  ;;  %v1865_v50 = vpop.eup %1864  ;;  %1872 = vrcp.f32 %v1140_v46  ;;  %v1141_v51 = vadd.f32 1.0, %v1863_v49 }
 0x228   : > { %1874 = vrcp.f32 %v1138_v5  ;;  %v1139_v52 = vadd.f32 1.0, %v1865_v50  ;;  %v1867_v57 = vpop.eup %1866  ;;  %v1312_v5 = vld [vmem:[#allocation2 + $0x50] sm:$0xff] }
 0x229   : > { %v1869_v58 = vpop.eup %1868  ;;  %v1184_v61 = vmul.f32 %v1867_v57, %v2222_v22 }
 0x22a   : > { %1876 = vrcp.f32 %v1139_v52  ;;  %v1183_v0 = vmul.f32 %v1869_v58, %v2227_v29  ;;  %v1871_v2 = vpop.eup %1870 }
 0x22b   : > { %1330 = vadd.xlane.f32.xlu1 %v1292_v53  ;;  %1328 = vadd.xlane.f32.xlu0 %v1291_v54  ;;  %1878 = vrcp.f32 %v1141_v51  ;;  %v1296_v6 = vsel %vm1285_vm4, %v1184_v61, 0.0  ;;  %v1185_v44 = vmul.f32 %v1871_v2, %v2230_v31  ;;  %v1311_v51 = vld [vmem:[#allocation2 + $0x48] sm:$0xff]  ;;  %v1313_v61 = vld [vmem:[#allocation2 + $0x58] sm:$0xff] }
 0x22c   : > { %v1295_v3 = vsel %vm1285_vm4, %v1183_v0, 0.0 }
 0x22d   : > { %v1297_v11 = vsel %vm1285_vm4, %v1185_v44, 0.0 }
 0x22f   : > { %1334 = vadd.xlane.f32.xlu1 %v1294_v59  ;;  %1332 = vadd.xlane.f32.xlu0 %v1293_v60  ;;  %v1314_v59 = vld [vmem:[#allocation2 + $0x60] sm:$0xff] }
 0x231   : > { %v1873_v25 = vpop.eup %1872 }
 0x232   : > { %v1875_v7 = vpop.eup %1874  ;;  %v1188_v15 = vmul.f32 %v1873_v25, %v2235_v1  ;;  %v1302_v1 = vld [vmem:[#allocation2] sm:$0xff] }
 0x233   : > { %1338 = vadd.xlane.f32.xlu1 %v1296_v6  ;;  %1336 = vadd.xlane.f32.xlu0 %v1295_v3  ;;  %v1186_v12 = vmul.f32 %v1875_v7, %v2237_v4 }
 0x234   : > { %v1877_v22 = vpop.eup %1876  ;;  %v1300_v31 = vsel %vm1285_vm4, %v1188_v15, 0.0 }
 0x235   : > { %v1298_v29 = vsel %vm1285_vm4, %v1186_v12, 0.0  ;;  %v1187_v16 = vmul.f32 %v1877_v22, %v2241_v13  ;;  %v1879_v17 = vpop.eup %1878  ;;  %v1316_v12 = vld [vmem:[#allocation2 + $0x70] sm:$0xff] }
 0x236   : > { %v1189_v18 = vmul.f32 %v1879_v17, %v2239_v8 }
 0x237   : > { %1342 = vadd.xlane.f32.xlu1 %v1298_v29  ;;  %1340 = vadd.xlane.f32.xlu0 %v1297_v11  ;;  %v1299_v4 = vsel %vm1285_vm4, %v1187_v16, 0.0  ;;  %v1315_v29 = vld [vmem:[#allocation2 + $0x68] sm:$0xff] }
 0x238   : > { %v1301_v19 = vsel %vm1285_vm4, %v1189_v18, 0.0 }
 0x23b   : > { %1346 = vadd.xlane.f32.xlu1 %v1300_v31  ;;  %1344 = vadd.xlane.f32.xlu0 %v1299_v4 }
 0x23f   : > { %1348 = vadd.xlane.f32.xlu0 %v1301_v19 }
 0x2ac   : > { %v1319_v20 = vpop.xlane.xlu0 %1318 }
 0x2ad   : > { %v1350_v13 = vadd.f32 %v1319_v20, %v1302_v1  ;;  %v1317_v1 = vld [vmem:[#allocation2 + $0x78] sm:$0xff] }
 0x2af   : > { %1367 = vst.msk [vmem:[#allocation2] sm:$0xff] %vm357_vm3, %v1350_v13 }
 0x2b0   : > { %v1321_v24 = vpop.xlane.xlu1 %1320  ;;  %v1323_v26 = vpop.xlane.xlu0 %1322 }
 0x2b1   : > { %v1351_v27 = vadd.f32 %v1321_v24, %v1303_v21  ;;  %v1352_v28 = vadd.f32 %v1323_v26, %v1304_v23 }
 0x2b3   : > { %1368 = vst.msk [vmem:[#allocation2 + $0x8] sm:$0xff] %vm357_vm3, %v1351_v27  ;;  %1369 = vst.msk [vmem:[#allocation2 + $0x10] sm:$0xff] %vm357_vm3, %v1352_v28 }
 0x2b4   : > { %v1327_v8 = vpop.xlane.xlu1 %1326  ;;  %v1325_v14 = vpop.xlane.xlu0 %1324 }
 0x2b5   : > { %v1354_v33 = vadd.f32 %v1327_v8, %v1306_v30  ;;  %v1353_v34 = vadd.f32 %v1325_v14, %v1305_v32 }
 0x2b6   : > { %v1386_v37 = vld [vmem:[#allocation2] sm:$0xff] }
 0x2b7   : > { %1371 = vst.msk [vmem:[#allocation2 + $0x20] sm:$0xff] %vm357_vm3, %v1354_v33  ;;  %1370 = vst.msk [vmem:[#allocation2 + $0x18] sm:$0xff] %vm357_vm3, %v1353_v34  ;;  %v1402_v38 = vmul.f32 0.015625, %v1386_v37  ;;  %v1418_v37 = vld [vmem:[%s2385_s7] sm:$0xff] }
 0x2b8   : > { %v1331_v62 = vpop.xlane.xlu1 %1330  ;;  %v1329_v39 = vpop.xlane.xlu0 %1328 }
 0x2b9   : > { %v1356_v40 = vadd.f32 %v1331_v62, %v1308_v35  ;;  %v1355_v41 = vadd.f32 %v1329_v39, %v1307_v36  ;;  %1436 = vperm.xlu1 %1768, %v1402_v38   ;;  %v1419_v38 = vld [vmem:[%s2385_s7 + $0x8] sm:$0xff]  ;;  %v1420_v62 = vld [vmem:[%s2385_s7 + $0x10] sm:$0xff] }
 0x2ba   : > { %v1387_v42 = vld [vmem:[#allocation2 + $0x8] sm:$0xff]  ;;  %v1388_v9 = vld [vmem:[#allocation2 + $0x10] sm:$0xff] }
 0x2bb   : > { %1373 = vst.msk [vmem:[#allocation2 + $0x30] sm:$0xff] %vm357_vm3, %v1356_v40  ;;  %1372 = vst.msk [vmem:[#allocation2 + $0x28] sm:$0xff] %vm357_vm3, %v1355_v41  ;;  %v1403_v45 = vmul.f32 0.015625, %v1387_v42  ;;  %v1404_v46 = vmul.f32 0.015625, %v1388_v9 }
 0x2bc   : > { %v1335_v47 = vpop.xlane.xlu1 %1334  ;;  %v1333_v48 = vpop.xlane.xlu0 %1332 }
 0x2bd   : > { %v1358_v63 = vadd.f32 %v1335_v47, %v1310_v56  ;;  %1441 = vperm.xlu0 %1767, %v1403_v45   ;;  %v1357_v49 = vadd.f32 %v1333_v48, %v1309_v43  ;;  %1446 = vperm.xlu1 %1768, %v1404_v46   ;;  %v1421_v43 = vld [vmem:[%s2385_s7 + $0x18] sm:$0xff]  ;;  %v1422_v45 = vld [vmem:[%s2385_s7 + $0x20] sm:$0xff] }
 0x2be   : > { %v1390_v50 = vld [vmem:[#allocation2 + $0x20] sm:$0xff]  ;;  %v1389_v52 = vld [vmem:[#allocation2 + $0x18] sm:$0xff] }
 0x2bf   : > { %1375 = vst.msk [vmem:[#allocation2 + $0x40] sm:$0xff] %vm357_vm3, %v1358_v63  ;;  %1374 = vst.msk [vmem:[#allocation2 + $0x38] sm:$0xff] %vm357_vm3, %v1357_v49  ;;  %v1406_v57 = vmul.f32 0.015625, %v1390_v50  ;;  %v1405_v53 = vmul.f32 0.015625, %v1389_v52  ;;  %v1423_v49 = vld [vmem:[%s2385_s7 + $0x28] sm:$0xff] }
 0x2c0   : > { %v1339_v54 = vpop.xlane.xlu1 %1338  ;;  %v1337_v55 = vpop.xlane.xlu0 %1336 }
 0x2c1   : > { %v1360_v10 = vadd.f32 %v1339_v54, %v1312_v5  ;;  %1456 = vperm.xlu0 %1767, %v1406_v57   ;;  %v1359_v58 = vadd.f32 %v1337_v55, %v1311_v51  ;;  %1451 = vperm.xlu1 %1768, %v1405_v53   ;;  %v1424_v51 = vld [vmem:[%s2385_s7 + $0x30] sm:$0xff]  ;;  %v1425_v55 = vld [vmem:[%s2385_s7 + $0x38] sm:$0xff] }
 0x2c2   : > { %v1392_v60 = vld [vmem:[#allocation2 + $0x30] sm:$0xff]  ;;  %v1391_v0 = vld [vmem:[#allocation2 + $0x28] sm:$0xff] }
 0x2c3   : > { %1377 = vst.msk [vmem:[#allocation2 + $0x50] sm:$0xff] %vm357_vm3, %v1360_v10  ;;  %1376 = vst.msk [vmem:[#allocation2 + $0x48] sm:$0xff] %vm357_vm3, %v1359_v58  ;;  %v1408_v2 = vmul.f32 0.015625, %v1392_v60  ;;  %v1407_v25 = vmul.f32 0.015625, %v1391_v0 }
 0x2c4   : > { %v1343_v6 = vpop.xlane.xlu1 %1342  ;;  %v1341_v3 = vpop.xlane.xlu0 %1340 }
 0x2c5   : > { %v1362_v44 = vadd.f32 %v1343_v6, %v1314_v59  ;;  %1466 = vperm.xlu0 %1767, %v1408_v2   ;;  %v1361_v7 = vadd.f32 %v1341_v3, %v1313_v61  ;;  %1461 = vperm.xlu1 %1768, %v1407_v25   ;;  %v1426_v59 = vld [vmem:[%s2385_s7 + $0x40] sm:$0xff]  ;;  %v1427_v25 = vld [vmem:[%s2385_s7 + $0x48] sm:$0xff] }
 0x2c6   : > { %v1394_v22 = vld [vmem:[#allocation2 + $0x40] sm:$0xff]  ;;  %v1393_v11 = vld [vmem:[#allocation2 + $0x38] sm:$0xff] }
 0x2c7   : > { %1379 = vst.msk [vmem:[#allocation2 + $0x60] sm:$0xff] %vm357_vm3, %v1362_v44  ;;  %1378 = vst.msk [vmem:[#allocation2 + $0x58] sm:$0xff] %vm357_vm3, %v1361_v7  ;;  %v1410_v15 = vmul.f32 0.015625, %v1394_v22  ;;  %v1409_v16 = vmul.f32 0.015625, %v1393_v11  ;;  %v1428_v44 = vld [vmem:[%s2385_s7 + $0x50] sm:$0xff]  ;;  %v1429_v11 = vld [vmem:[%s2385_s7 + $0x58] sm:$0xff] }
 0x2c8   : > { %v1347_v17 = vpop.xlane.xlu1 %1346  ;;  %v1345_v31 = vpop.xlane.xlu0 %1344 }
 0x2c9   : > { %v1364_v4 = vadd.f32 %v1347_v17, %v1316_v12  ;;  %1476 = vperm.xlu0 %1767, %v1410_v15   ;;  %v1363_v18 = vadd.f32 %v1345_v31, %v1315_v29  ;;  %1471 = vperm.xlu1 %1768, %v1409_v16   ;;  %v1430_v17 = vld [vmem:[%s2385_s7 + $0x60] sm:$0xff] }
 0x2ca   : > { %v1396_v19 = vld [vmem:[#allocation2 + $0x50] sm:$0xff]  ;;  %v1395_v20 = vld [vmem:[#allocation2 + $0x48] sm:$0xff] }
 0x2cb   : > { %1381 = vst.msk [vmem:[#allocation2 + $0x70] sm:$0xff] %vm357_vm3, %v1364_v4  ;;  %1380 = vst.msk [vmem:[#allocation2 + $0x68] sm:$0xff] %vm357_vm3, %v1363_v18  ;;  %v1412_v13 = vmul.f32 0.015625, %v1396_v19  ;;  %v1411_v21 = vmul.f32 0.015625, %v1395_v20 }
 0x2cc   : > { %v1349_v23 = vpop.xlane.xlu0 %1348 }
 0x2cd   : > { %1486 = vperm.xlu0 %1767, %v1412_v13   ;;  %v1365_v24 = vadd.f32 %v1349_v23, %v1317_v1  ;;  %1481 = vperm.xlu1 %1768, %v1411_v21   ;;  %v1431_v1 = vld [vmem:[%s2385_s7 + $0x68] sm:$0xff]  ;;  %v1432_v21 = vld [vmem:[%s2385_s7 + $0x70] sm:$0xff] }
 0x2ce   : > { %v1398_v26 = vld [vmem:[#allocation2 + $0x60] sm:$0xff]  ;;  %v1397_v27 = vld [vmem:[#allocation2 + $0x58] sm:$0xff] }
 0x2cf   : > { %1382 = vst.msk [vmem:[#allocation2 + $0x78] sm:$0xff] %vm357_vm3, %v1365_v24  ;;  %v1414_v28 = vmul.f32 0.015625, %v1398_v26  ;;  %v1413_v30 = vmul.f32 0.015625, %v1397_v27 }
 0x2d1   : > { %1496 = vperm.xlu0 %1767, %v1414_v28   ;;  %1491 = vperm.xlu1 %1768, %v1413_v30   ;;  %v1433_v28 = vld [vmem:[%s2385_s7 + $0x78] sm:$0xff] }
 0x2d2   : > { %v1400_v32 = vld [vmem:[#allocation2 + $0x70] sm:$0xff]  ;;  %v1399_v8 = vld [vmem:[#allocation2 + $0x68] sm:$0xff] }
 0x2d3   : > { %v1416_v14 = vmul.f32 0.015625, %v1400_v32  ;;  %v1415_v33 = vmul.f32 0.015625, %v1399_v8 }
 0x2d5   : > { %1506 = vperm.xlu0 %1767, %v1416_v14   ;;  %1501 = vperm.xlu1 %1768, %v1415_v33  }
 0x2d6   : > { %v1401_v34 = vld [vmem:[#allocation2 + $0x78] sm:$0xff] }
 0x2d7   : > { %v1417_v35 = vmul.f32 0.015625, %v1401_v34 }
 0x2d9   : > { %1511 = vperm.xlu1 %1768, %v1417_v35  }
 0x338   : > { %v1437_v36 = vpop.permute.xlu1 %1436 }
 0x339   : > { %v1514_v41 = vmul.f32 %v1437_v36, %v1418_v37 }
 0x33c   : > { %v1442_v39 = vpop.permute.xlu0 %1441  ;;  %v1447_v40 = vpop.permute.xlu1 %1446 }
 0x33d   : > { %v1515_v56 = vmul.f32 %v1442_v39, %v1419_v38  ;;  %v1516_v42 = vmul.f32 %v1447_v40, %v1420_v62  ;;  %v1551_v39 = vld [vmem:[%s2386_s8] sm:$0x1] }
 0x33f   : > { %v1530_v9 = vadd.f32 %v1515_v56, %v1514_v41 }
 0x340   : > { %v1457_v46 = vpop.permute.xlu0 %1456  ;;  %v1452_v47 = vpop.permute.xlu1 %1451 }
 0x341   : > { %v1531_v48 = vadd.f32 %v1530_v9, %v1516_v42  ;;  %v1517_v63 = vmul.f32 %v1452_v47, %v1421_v43  ;;  %v1518_v5 = vmul.f32 %v1457_v46, %v1422_v45 }
 0x343   : > { %v1532_v50 = vadd.f32 %v1531_v48, %v1517_v63 }
 0x344   : > { %v1467_v52 = vpop.permute.xlu0 %1466  ;;  %v1462_v57 = vpop.permute.xlu1 %1461 }
 0x345   : > { %v1533_v53 = vadd.f32 %v1532_v50, %v1518_v5  ;;  %v1519_v54 = vmul.f32 %v1462_v57, %v1423_v49  ;;  %v1520_v10 = vmul.f32 %v1467_v52, %v1424_v51 }
 0x347   : > { %v1534_v58 = vadd.f32 %v1533_v53, %v1519_v54 }
 0x348   : > { %v1477_v60 = vpop.permute.xlu0 %1476  ;;  %v1472_v61 = vpop.permute.xlu1 %1471 }
 0x349   : > { %v1535_v0 = vadd.f32 %v1534_v58, %v1520_v10  ;;  %v1521_v2 = vmul.f32 %v1472_v61, %v1425_v55  ;;  %v1522_v6 = vmul.f32 %v1477_v60, %v1426_v59 }
 0x34b   : > { %v1536_v3 = vadd.f32 %v1535_v0, %v1521_v2 }
 0x34c   : > { %v1487_v7 = vpop.permute.xlu0 %1486  ;;  %v1482_v12 = vpop.permute.xlu1 %1481 }
 0x34d   : > { %v1537_v22 = vadd.f32 %v1536_v3, %v1522_v6  ;;  %v1523_v29 = vmul.f32 %v1482_v12, %v1427_v25  ;;  %v1524_v15 = vmul.f32 %v1487_v7, %v1428_v44 }
 0x34f   : > { %v1538_v16 = vadd.f32 %v1537_v22, %v1523_v29 }
 0x350   : > { %v1497_v31 = vpop.permute.xlu0 %1496  ;;  %v1492_v4 = vpop.permute.xlu1 %1491 }
 0x351   : > { %v1539_v18 = vadd.f32 %v1538_v16, %v1524_v15  ;;  %v1525_v19 = vmul.f32 %v1492_v4, %v1429_v11  ;;  %v1526_v20 = vmul.f32 %v1497_v31, %v1430_v17 }
 0x353   : > { %v1540_v13 = vadd.f32 %v1539_v18, %v1525_v19 }
 0x354   : > { %v1507_v23 = vpop.permute.xlu0 %1506  ;;  %v1502_v24 = vpop.permute.xlu1 %1501 }
 0x355   : > { %v1541_v26 = vadd.f32 %v1540_v13, %v1526_v20  ;;  %v1527_v27 = vmul.f32 %v1502_v24, %v1431_v1  ;;  %v1528_v30 = vmul.f32 %v1507_v23, %v1432_v21 }
 0x357   : > { %v1542_v32 = vadd.f32 %v1541_v26, %v1527_v27 }
 0x358   : > { %v1512_v8 = vpop.permute.xlu1 %1511 }
 0x359   : > { %v1543_v14 = vadd.f32 %v1542_v32, %v1528_v30  ;;  %v1529_v33 = vmul.f32 %v1512_v8, %v1433_v28 }
 0x35b   : > { %v1544_v34 = vadd.f32 %v1543_v14, %v1529_v33 }
 0x35d   : > { %v1545_v35 = vrot.slane %v1544_v34, 4 }
 0x35f   : > { %v1546_v36 = vadd.f32 %v1545_v35, %v1544_v34 }
 0x361   : > { %v1547_v37 = vrot.slane %v1546_v36, 2 }
 0x363   : > { %v1548_v38 = vadd.f32 %v1547_v37, %v1546_v36 }
 0x365   : > { %v1549_v62 = vrot.slane %v1548_v38, 1 }
 0x367   : > { %v1550_v40 = vadd.f32 %v1549_v62, %v1548_v38 }
 0x369   : > { %v1552_v41 = vadd.f32 %v1551_v39, %v1550_v40 }
 0x36b   : > { %1553 = vst [vmem:[%s351_s20] sm:$0x1] %v1552_v41 }
 0x36c PF: > { %s19_s11 = sadd.s32 1, %s1902_s11   ;;  %s2388_s30 = smov %s1898_s10 }
 0x36d   : > { %p16_p5 = scmp.ge.s32.totalorder %s19_s11, 4   ;;  %s2389_s10 = smov %s2391_s12 }
 0x36f   :  { %18 = sbr.rel (!%p16_p5) target bundleno = 2 (0x2), region = 102 }

</bundles_post_ra>
